<compile_context>
chip_gen: v6e
topology: v6e:2x2x1
jax: 0.10.0
libtpu: 0.0.40
codegen_flags: <defaults>
</compile_context>

<pallas_src>
import functools

import jax
import jax.numpy as jnp
import numpy as np
from jax.experimental import pallas as pl
from jax.experimental.pallas import tpu as pltpu


def _round_up(x, m):
    return ((x + m - 1) // m) * m


# ----------------------------- Pallas kernel ------------------------------ #
def _smoothness_kernel(mask_ref, neigh_ref, ppl_ref, psum_ref, *, p):
    """Per-tile L_p norm over channels + per-tile partial sum.

    mask_ref : (B, C, NT)  VMEM  mask tile, channel-major, points on lanes
    neigh_ref: (C, K, NT)  VMEM  neighbor masks gathered from batch 0
    ppl_ref  : (B, K, NT)  VMEM  per-point smoothness loss for this tile
    psum_ref : (1, 8, 128) VMEM  this tile's partial sum (scalar, broadcast)
    """
    B, C, NT = mask_ref.shape
    K = neigh_ref.shape[1]

    acc = jnp.zeros((B, K, NT), jnp.float32)
    # Unrolled loop over channels (C is tiny): loads one channel slab at a
    # time and accumulates, avoiding a C-times-larger 4-D intermediate.
    for c in range(C):
        m_c = mask_ref[:, c, :]                       # (B, NT)
        n_c = neigh_ref[c]                            # (K, NT)
        d = m_c[:, None, :] - n_c[None, :, :]         # (B, K, NT)
        if p == 1:
            acc = acc + jnp.abs(d)
        elif p == 2:
            acc = acc + d * d
        else:
            acc = acc + jnp.abs(d) ** p

    if p == 1:
        ppl = acc
    elif p == 2:
        ppl = jnp.sqrt(acc)
    else:
        ppl = acc ** (1.0 / p)

    ppl_ref[...] = ppl.astype(ppl_ref.dtype)
    # Per-tile partial sum -> keeps the grid axis "parallel"; the final
    # mean (sum of partials * 1/count) happens in the wrapper.
    psum_ref[...] = jnp.broadcast_to(jnp.sum(ppl), psum_ref.shape)


def _smoothness_pallas(mask_t, neigh_t, *, p, block_n=512):
    """mask_t: (B, C, N) f32, neigh_t: (C, K, N) f32.

    Returns (per-point loss (B, K, N) f32, per-tile partial sums (T,) f32).
    """
    B, C, N = mask_t.shape
    K = neigh_t.shape[1]

    # Lane-dense tile size along N (multiple of 128), padded with zeros.
    nt = _round_up(min(int(block_n), _round_up(N, 128)), 128)
    npad = _round_up(N, nt)
    if npad != N:
        # Zero padding contributes |0 - 0| = 0 to every sum -> exact result.
        mask_t = jnp.pad(mask_t, ((0, 0), (0, 0), (0, npad - N)))
        neigh_t = jnp.pad(neigh_t, ((0, 0), (0, 0), (0, npad - N)))
    num_tiles = npad // nt

    kernel = functools.partial(_smoothness_kernel, p=p)

    # VMEM budget: double-buffered input/output tiles + headroom (fits the
    # 32 MiB scoped default on every generation, incl. v7x's 64 MiB VMEM).
    tile_bytes = 4 * nt * (B * C + C * K + B * K) + 4 * 8 * 128
    vmem_limit = int(min(max(6 * tile_bytes, 8 << 20), 48 << 20))

    ppl_pad, psums = pl.pallas_call(
        kernel,
        out_shape=(
            jax.ShapeDtypeStruct((B, K, npad), jnp.float32),
            jax.ShapeDtypeStruct((num_tiles, 8, 128), jnp.float32),
        ),
        grid=(num_tiles,),
        in_specs=[
            pl.BlockSpec((B, C, nt), lambda i: (0, 0, i)),
            pl.BlockSpec((C, K, nt), lambda i: (0, 0, i)),
        ],
        out_specs=(
            pl.BlockSpec((B, K, nt), lambda i: (0, 0, i)),
            pl.BlockSpec((1, 8, 128), lambda i: (i, 0, 0)),
        ),
        compiler_params=pltpu.CompilerParams(
            dimension_semantics=("parallel",),
            vmem_limit_bytes=vmem_limit,
        ),
    )(mask_t, neigh_t)

    return ppl_pad[:, :, :N], psums[:, 0, 0]


# ------------------------------ Module glue ------------------------------- #
def _knn_points(pc, K):
    """Squared-distance KNN (like pytorch3d.knn_points, sorted ascending)."""
    # pc: (B, N, D)
    d2 = jnp.sum((pc[:, :, None, :] - pc[:, None, :, :]) ** 2, axis=-1)  # (B,N,N)
    neg_d, idx = jax.lax.top_k(-d2, K)   # K smallest squared distances
    return -neg_d, idx                   # (B,N,K), (B,N,K)


class InstanceSmoothnessLoss:
    """JAX/Pallas port of the PyTorch InstanceSmoothnessLoss."""

    def __init__(self, pc, K=8, max_radius=1, loss_norm=1, block_n=512):
        self.K = K
        self.max_radius = max_radius
        self.loss_norm = loss_norm
        self.block_n = block_n
        # TODO(synk): KNN index construction is __init__-time setup; kept in
        # plain JAX (not a Pallas hot path).
        dist, nn_ind = _knn_points(pc, K)
        tmp_idx = jnp.broadcast_to(nn_ind[:, :, 0:1], nn_ind.shape)
        # NOTE: matches the PyTorch original, which compares the *squared*
        # knn distance against max_radius directly.
        self.nn_ind = jnp.where(dist > max_radius, tmp_idx, nn_ind)
        # Pre-transposed (K, N) indices for batch 0 so the wrapper gather
        # lands directly in the kernel's (C, K, N) layout (no extra relayout
        # of the K-times-larger neighbor array).
        self._nn_ind0_t = jnp.transpose(self.nn_ind[0], (1, 0))

    def __call__(self, mask):
        # mask: (B, N, C) float32
        B, N, C = mask.shape
        mask_t = jnp.transpose(mask, (0, 2, 1)).astype(jnp.float32)   # (B, C, N)
        # Gather neighbor masks from batch 0 directly in (C, K, N) layout.
        neigh_t = jnp.take(mask_t[0], self._nn_ind0_t, axis=1)        # (C, K, N)

        ppl_t, psums = _smoothness_pallas(
            mask_t, neigh_t, p=self.loss_norm, block_n=self.block_n)

        # (B, K, N) -> (B, N, K) to match the PyTorch return convention.
        per_point_smooth_loss = jnp.transpose(ppl_t, (0, 2, 1))
        smooth_loss = jnp.sum(psums) * (1.0 / float(B * self.K * N))
        return smooth_loss, per_point_smooth_loss


# ------------------------------- reference -------------------------------- #
def _reference(mask, nn_ind, p):
    out = mask[0][nn_ind[0]]                      # (N, K, C)
    out = jnp.transpose(out, (0, 2, 1))[None]     # (1, N, C, K)
    diff = mask[..., None] - out                  # (B, N, C, K)
    if p == 1:
        ppl = jnp.sum(jnp.abs(diff), axis=2)
    else:
        ppl = jnp.sum(jnp.abs(diff) ** p, axis=2) ** (1.0 / p)
    return jnp.mean(ppl), ppl


if __name__ == "__main__":
    key = jax.random.PRNGKey(0)
    k_pc, k_mask = jax.random.split(key)

    # Small shapes; N is deliberately NOT a tile multiple to exercise padding,
    # and block_n=128 gives a 2-step (parallel) grid.
    B, N, C, K = 2, 200, 8, 8
    pc = jax.random.uniform(k_pc, (B, N, 3), dtype=jnp.float32) * 2.0
    mask = jax.random.uniform(k_mask, (B, N, C), dtype=jnp.float32)

    loss_mod = InstanceSmoothnessLoss(pc, K=K, max_radius=1, loss_norm=1,
                                      block_n=128)

    smooth_loss, per_point = loss_mod(mask)
    smooth_loss = jax.block_until_ready(smooth_loss)
    per_point = jax.block_until_ready(per_point)

    ref_loss, ref_ppl = _reference(mask, loss_mod.nn_ind, p=1)

    assert per_point.shape == (B, N, K)
    np.testing.assert_allclose(np.asarray(per_point), np.asarray(ref_ppl),
                               rtol=1e-5, atol=1e-5)
    np.testing.assert_allclose(float(smooth_loss), float(ref_loss),
                               rtol=1e-4, atol=1e-5)

    print("KERNEL_OK")
</pallas_src>

<mosaic_0001>
module attributes {stable_mosaic.version = 11 : i64} {
  func.func @_smoothness_kernel(%arg0: i32, %arg1: memref<2x8x128xf32, #tpu.memory_space<vmem>>, %arg2: memref<8x8x128xf32, #tpu.memory_space<vmem>>, %arg3: memref<2x8x128xf32, #tpu.memory_space<vmem>>, %arg4: memref<1x8x128xf32, #tpu.memory_space<vmem>>) attributes {dimension_semantics = [#tpu.dimension_semantics<parallel>], iteration_bounds = array<i64: 2>, scalar_prefetch = 0 : i64, scratch_operands = 0 : i64, tpu.core_type = #tpu.core_type<tc>, window_params = [{transform_indices = @transform_0, window_bounds = array<i64: 2, 8, 128>}, {transform_indices = @transform_1, window_bounds = array<i64: 8, 8, 128>}, {transform_indices = @transform_2, window_bounds = array<i64: 2, 8, 128>}, {transform_indices = @transform_3, window_bounds = array<i64: 1, 8, 128>}]} {
    %cst = arith.constant 0.000000e+00 : f32
    %0 = vector.broadcast %cst : f32 to vector<2x8x128xf32>
    %c0 = arith.constant 0 : index
    %c0_0 = arith.constant 0 : index
    %c0_1 = arith.constant 0 : index
    %1 = vector.load %arg1[%c0, %c0_0, %c0_1] : memref<2x8x128xf32, #tpu.memory_space<vmem>>, vector<2x1x128xf32>
    %2 = vector.shape_cast %1 : vector<2x1x128xf32> to vector<2x128xf32>
    %c0_2 = arith.constant 0 : index
    %c0_3 = arith.constant 0 : index
    %c0_4 = arith.constant 0 : index
    %3 = vector.load %arg2[%c0_2, %c0_3, %c0_4] : memref<8x8x128xf32, #tpu.memory_space<vmem>>, vector<1x8x128xf32>
    %4 = vector.shape_cast %3 : vector<1x8x128xf32> to vector<8x128xf32>
    %5 = vector.shape_cast %2 : vector<2x128xf32> to vector<2x1x128xf32>
    %6 = vector.shape_cast %4 : vector<8x128xf32> to vector<1x8x128xf32>
    %7 = vector.broadcast %5 : vector<2x1x128xf32> to vector<2x8x128xf32>
    %8 = vector.broadcast %6 : vector<1x8x128xf32> to vector<2x8x128xf32>
    %9 = arith.subf %7, %8 : vector<2x8x128xf32>
    %10 = math.absf %9 : vector<2x8x128xf32>
    %11 = arith.addf %0, %10 : vector<2x8x128xf32>
    %c0_5 = arith.constant 0 : index
    %c1 = arith.constant 1 : index
    %c0_6 = arith.constant 0 : index
    %12 = vector.load %arg1[%c0_5, %c1, %c0_6] : memref<2x8x128xf32, #tpu.memory_space<vmem>>, vector<2x1x128xf32>
    %13 = vector.shape_cast %12 : vector<2x1x128xf32> to vector<2x128xf32>
    %c1_7 = arith.constant 1 : index
    %c0_8 = arith.constant 0 : index
    %c0_9 = arith.constant 0 : index
    %14 = vector.load %arg2[%c1_7, %c0_8, %c0_9] : memref<8x8x128xf32, #tpu.memory_space<vmem>>, vector<1x8x128xf32>
    %15 = vector.shape_cast %14 : vector<1x8x128xf32> to vector<8x128xf32>
    %16 = vector.shape_cast %13 : vector<2x128xf32> to vector<2x1x128xf32>
    %17 = vector.shape_cast %15 : vector<8x128xf32> to vector<1x8x128xf32>
    %18 = vector.broadcast %16 : vector<2x1x128xf32> to vector<2x8x128xf32>
    %19 = vector.broadcast %17 : vector<1x8x128xf32> to vector<2x8x128xf32>
    %20 = arith.subf %18, %19 : vector<2x8x128xf32>
    %21 = math.absf %20 : vector<2x8x128xf32>
    %22 = arith.addf %11, %21 : vector<2x8x128xf32>
    %c0_10 = arith.constant 0 : index
    %c2 = arith.constant 2 : index
    %c0_11 = arith.constant 0 : index
    %23 = vector.load %arg1[%c0_10, %c2, %c0_11] : memref<2x8x128xf32, #tpu.memory_space<vmem>>, vector<2x1x128xf32>
    %24 = vector.shape_cast %23 : vector<2x1x128xf32> to vector<2x128xf32>
    %c2_12 = arith.constant 2 : index
    %c0_13 = arith.constant 0 : index
    %c0_14 = arith.constant 0 : index
    %25 = vector.load %arg2[%c2_12, %c0_13, %c0_14] : memref<8x8x128xf32, #tpu.memory_space<vmem>>, vector<1x8x128xf32>
    %26 = vector.shape_cast %25 : vector<1x8x128xf32> to vector<8x128xf32>
    %27 = vector.shape_cast %24 : vector<2x128xf32> to vector<2x1x128xf32>
    %28 = vector.shape_cast %26 : vector<8x128xf32> to vector<1x8x128xf32>
    %29 = vector.broadcast %27 : vector<2x1x128xf32> to vector<2x8x128xf32>
    %30 = vector.broadcast %28 : vector<1x8x128xf32> to vector<2x8x128xf32>
    %31 = arith.subf %29, %30 : vector<2x8x128xf32>
    %32 = math.absf %31 : vector<2x8x128xf32>
    %33 = arith.addf %22, %32 : vector<2x8x128xf32>
    %c0_15 = arith.constant 0 : index
    %c3 = arith.constant 3 : index
    %c0_16 = arith.constant 0 : index
    %34 = vector.load %arg1[%c0_15, %c3, %c0_16] : memref<2x8x128xf32, #tpu.memory_space<vmem>>, vector<2x1x128xf32>
    %35 = vector.shape_cast %34 : vector<2x1x128xf32> to vector<2x128xf32>
    %c3_17 = arith.constant 3 : index
    %c0_18 = arith.constant 0 : index
    %c0_19 = arith.constant 0 : index
    %36 = vector.load %arg2[%c3_17, %c0_18, %c0_19] : memref<8x8x128xf32, #tpu.memory_space<vmem>>, vector<1x8x128xf32>
    %37 = vector.shape_cast %36 : vector<1x8x128xf32> to vector<8x128xf32>
    %38 = vector.shape_cast %35 : vector<2x128xf32> to vector<2x1x128xf32>
    %39 = vector.shape_cast %37 : vector<8x128xf32> to vector<1x8x128xf32>
    %40 = vector.broadcast %38 : vector<2x1x128xf32> to vector<2x8x128xf32>
    %41 = vector.broadcast %39 : vector<1x8x128xf32> to vector<2x8x128xf32>
    %42 = arith.subf %40, %41 : vector<2x8x128xf32>
    %43 = math.absf %42 : vector<2x8x128xf32>
    %44 = arith.addf %33, %43 : vector<2x8x128xf32>
    %c0_20 = arith.constant 0 : index
    %c4 = arith.constant 4 : index
    %c0_21 = arith.constant 0 : index
    %45 = vector.load %arg1[%c0_20, %c4, %c0_21] : memref<2x8x128xf32, #tpu.memory_space<vmem>>, vector<2x1x128xf32>
    %46 = vector.shape_cast %45 : vector<2x1x128xf32> to vector<2x128xf32>
    %c4_22 = arith.constant 4 : index
    %c0_23 = arith.constant 0 : index
    %c0_24 = arith.constant 0 : index
    %47 = vector.load %arg2[%c4_22, %c0_23, %c0_24] : memref<8x8x128xf32, #tpu.memory_space<vmem>>, vector<1x8x128xf32>
    %48 = vector.shape_cast %47 : vector<1x8x128xf32> to vector<8x128xf32>
    %49 = vector.shape_cast %46 : vector<2x128xf32> to vector<2x1x128xf32>
    %50 = vector.shape_cast %48 : vector<8x128xf32> to vector<1x8x128xf32>
    %51 = vector.broadcast %49 : vector<2x1x128xf32> to vector<2x8x128xf32>
    %52 = vector.broadcast %50 : vector<1x8x128xf32> to vector<2x8x128xf32>
    %53 = arith.subf %51, %52 : vector<2x8x128xf32>
    %54 = math.absf %53 : vector<2x8x128xf32>
    %55 = arith.addf %44, %54 : vector<2x8x128xf32>
    %c0_25 = arith.constant 0 : index
    %c5 = arith.constant 5 : index
    %c0_26 = arith.constant 0 : index
    %56 = vector.load %arg1[%c0_25, %c5, %c0_26] : memref<2x8x128xf32, #tpu.memory_space<vmem>>, vector<2x1x128xf32>
    %57 = vector.shape_cast %56 : vector<2x1x128xf32> to vector<2x128xf32>
    %c5_27 = arith.constant 5 : index
    %c0_28 = arith.constant 0 : index
    %c0_29 = arith.constant 0 : index
    %58 = vector.load %arg2[%c5_27, %c0_28, %c0_29] : memref<8x8x128xf32, #tpu.memory_space<vmem>>, vector<1x8x128xf32>
    %59 = vector.shape_cast %58 : vector<1x8x128xf32> to vector<8x128xf32>
    %60 = vector.shape_cast %57 : vector<2x128xf32> to vector<2x1x128xf32>
    %61 = vector.shape_cast %59 : vector<8x128xf32> to vector<1x8x128xf32>
    %62 = vector.broadcast %60 : vector<2x1x128xf32> to vector<2x8x128xf32>
    %63 = vector.broadcast %61 : vector<1x8x128xf32> to vector<2x8x128xf32>
    %64 = arith.subf %62, %63 : vector<2x8x128xf32>
    %65 = math.absf %64 : vector<2x8x128xf32>
    %66 = arith.addf %55, %65 : vector<2x8x128xf32>
    %c0_30 = arith.constant 0 : index
    %c6 = arith.constant 6 : index
    %c0_31 = arith.constant 0 : index
    %67 = vector.load %arg1[%c0_30, %c6, %c0_31] : memref<2x8x128xf32, #tpu.memory_space<vmem>>, vector<2x1x128xf32>
    %68 = vector.shape_cast %67 : vector<2x1x128xf32> to vector<2x128xf32>
    %c6_32 = arith.constant 6 : index
    %c0_33 = arith.constant 0 : index
    %c0_34 = arith.constant 0 : index
    %69 = vector.load %arg2[%c6_32, %c0_33, %c0_34] : memref<8x8x128xf32, #tpu.memory_space<vmem>>, vector<1x8x128xf32>
    %70 = vector.shape_cast %69 : vector<1x8x128xf32> to vector<8x128xf32>
    %71 = vector.shape_cast %68 : vector<2x128xf32> to vector<2x1x128xf32>
    %72 = vector.shape_cast %70 : vector<8x128xf32> to vector<1x8x128xf32>
    %73 = vector.broadcast %71 : vector<2x1x128xf32> to vector<2x8x128xf32>
    %74 = vector.broadcast %72 : vector<1x8x128xf32> to vector<2x8x128xf32>
    %75 = arith.subf %73, %74 : vector<2x8x128xf32>
    %76 = math.absf %75 : vector<2x8x128xf32>
    %77 = arith.addf %66, %76 : vector<2x8x128xf32>
    %c0_35 = arith.constant 0 : index
    %c7 = arith.constant 7 : index
    %c0_36 = arith.constant 0 : index
    %78 = vector.load %arg1[%c0_35, %c7, %c0_36] : memref<2x8x128xf32, #tpu.memory_space<vmem>>, vector<2x1x128xf32>
    %79 = vector.shape_cast %78 : vector<2x1x128xf32> to vector<2x128xf32>
    %c7_37 = arith.constant 7 : index
    %c0_38 = arith.constant 0 : index
    %c0_39 = arith.constant 0 : index
    %80 = vector.load %arg2[%c7_37, %c0_38, %c0_39] : memref<8x8x128xf32, #tpu.memory_space<vmem>>, vector<1x8x128xf32>
    %81 = vector.shape_cast %80 : vector<1x8x128xf32> to vector<8x128xf32>
    %82 = vector.shape_cast %79 : vector<2x128xf32> to vector<2x1x128xf32>
    %83 = vector.shape_cast %81 : vector<8x128xf32> to vector<1x8x128xf32>
    %84 = vector.broadcast %82 : vector<2x1x128xf32> to vector<2x8x128xf32>
    %85 = vector.broadcast %83 : vector<1x8x128xf32> to vector<2x8x128xf32>
    %86 = arith.subf %84, %85 : vector<2x8x128xf32>
    %87 = math.absf %86 : vector<2x8x128xf32>
    %88 = arith.addf %77, %87 : vector<2x8x128xf32>
    %c0_40 = arith.constant 0 : index
    %c0_41 = arith.constant 0 : index
    %c0_42 = arith.constant 0 : index
    %89 = vector.load %arg3[%c0_40, %c0_41, %c0_42] : memref<2x8x128xf32, #tpu.memory_space<vmem>>, vector<2x8x128xf32>
    tpu.vector_store %arg3[%c0_40, %c0_41, %c0_42], %88 {strides = array<i32>} : memref<2x8x128xf32, #tpu.memory_space<vmem>>, vector<2x8x128xf32>,
    %90 = vector.shape_cast %88 : vector<2x8x128xf32> to vector<1x2x8x128xf32>
    %cst_43 = arith.constant dense<0.000000e+00> : vector<1xf32>
    %91 = vector.multi_reduction <add>, %90, %cst_43 [1, 2, 3] : vector<1x2x8x128xf32> to vector<1xf32>
    %92 = vector.shape_cast %91 : vector<1xf32> to vector<1x1x1x1xf32>
    %93 = vector.extract %92[0, 0, 0, 0] : f32 from vector<1x1x1x1xf32>
    %94 = vector.broadcast %93 : f32 to vector<1x8x128xf32>
    %c0_44 = arith.constant 0 : index
    %c0_45 = arith.constant 0 : index
    %c0_46 = arith.constant 0 : index
    %95 = vector.load %arg4[%c0_44, %c0_45, %c0_46] : memref<1x8x128xf32, #tpu.memory_space<vmem>>, vector<1x8x128xf32>
    tpu.vector_store %arg4[%c0_44, %c0_45, %c0_46], %94 {strides = array<i32>} : memref<1x8x128xf32, #tpu.memory_space<vmem>>, vector<1x8x128xf32>,
    return
  }
  func.func @transform_0(%arg0: i32) -> (i32, i32, i32) {
    %c0_i32 = arith.constant 0 : i32
    %c0_i32_0 = arith.constant 0 : i32
    %c0_i32_1 = arith.constant 0 : i32
    return %c0_i32, %c0_i32_0, %arg0 : i32, i32, i32
  }
  func.func @transform_1(%arg0: i32) -> (i32, i32, i32) {
    %c0_i32 = arith.constant 0 : i32
    %c0_i32_0 = arith.constant 0 : i32
    %c0_i32_1 = arith.constant 0 : i32
    return %c0_i32, %c0_i32_0, %arg0 : i32, i32, i32
  }
  func.func @transform_2(%arg0: i32) -> (i32, i32, i32) {
    %c0_i32 = arith.constant 0 : i32
    %c0_i32_0 = arith.constant 0 : i32
    %c0_i32_1 = arith.constant 0 : i32
    return %c0_i32, %c0_i32_0, %arg0 : i32, i32, i32
  }
  func.func @transform_3(%arg0: i32) -> (i32, i32, i32) {
    %c0_i32 = arith.constant 0 : i32
    %c0_i32_0 = arith.constant 0 : i32
    %c0_i32_1 = arith.constant 0 : i32
    return %arg0, %c0_i32, %c0_i32_0 : i32, i32, i32
  }
}

</mosaic_0001>

<bundles_post_ra>
// kernel: tpu_custom_call.1
= control target key start
LH: loop header
LB: loop body
LE: loop exit
PB: predicated region body
PF: predicated region fallthrough
CT: control target
= control target key end

     0   :  { %9 = vsyncpa [#allocation3], 0  ;;  %s1122_s0 = inlined_call_operand.hbm [shape: f32[2,8,256], index: 0, kind: input, shape index: {}]   ;;  %s1123_s1 = inlined_call_operand.hbm [shape: f32[8,8,256], index: 1, kind: input, shape index: {}]   ;;  %s1124_s2 = inlined_call_operand.hbm [shape: f32[2,8,256], index: 2, kind: output, shape index: {0}]   ;;  %s1125_s3 = inlined_call_operand.hbm [shape: f32[2,8,128], index: 3, kind: output, shape index: {1}]  }
   0x1   :  { %11 = vsyncpa [#allocation3 + $0x1], 0 }
   0x2   :  { %12 = vsyncpa [#allocation6], 0 }
   0x3   :  { %14 = vsyncpa [#allocation6 + $0x1], 0 }
   0x4   :  { %15 = vsyncpa [#allocation4], 0 }
   0x5   :  { %17 = vsyncpa [#allocation4 + $0x1], 0 }
   0x6   :  { %18 = vsyncpa [#allocation9], 0 }
   0x7   :  { %20 = vsyncpa [#allocation9 + $0x1], 0  ;;  %s845_s12 = smov 0   ;;  %s847_s13 = smov 0  }
   0x8   :  { %s849_s14 = smov 0   ;;  %s851_s15 = smov 0  }
   0x9 LB: > { %s866_s16 = sadd.s32 4294967295, %s813_s15   ;;  %s554_s17 = sadd.s32 4294967294, %s813_s15   ;;  %s813_s15 = sphi %s851_s15, %s1142_s15   ;;  %s809_s14 = sphi %s849_s14, %s1141_s14   ;;  %s805_s13 = sphi %s847_s13, %s1140_s13   ;;  %s801_s12 = sphi %s845_s12, %s1139_s12  }
   0xa   : > { %s870_s18 = sadd.s32 1, %s813_s15   ;;  %s33_s19 = sadd.s32 1, %s809_s14 }
   0xb   : > { %s30_s20 = ssub.s32 %s813_s15, %s870_s18  ;;  %p40_p0 = scmp.ne.s32.totalorder %s809_s14, %s805_s13 }
   0xc   : > { %p31_p1 = scmp.eq.s32.totalorder %s30_s20, 0  ;;  %p41_p2 = scmp.eq.s32.totalorder %s813_s15, 0 }
   0xd   : > { %p46_p3 = scmp.ne.s32.totalorder %s805_s13, %s801_s12  ;;  %p47_p4 = scmp.eq.s32.totalorder %s866_s16, 0 }
   0xe   : > { %s882_s21 = scalar_select %p31_p1, %s809_s14, %s33_s19  }
   0xf   : > { %p884_p5 = por %p41_p2, %p40_p0  ;;  %p888_p6 = por %p47_p4, %p46_p3 }
  0x10   : > { %p96_p7 = scmp.eq.s32.totalorder %s866_s16, 1  ;;  %p102_p8 = scmp.eq.s32.totalorder %s554_s17, 1 }
  0x11   : > { %s1129_s23 = scalar_select %p888_p6, 1, 0 }
  0x12   : > { %p619_p10 = scmp.lt.s32.totalorder %s813_s15, 2  ;;  %p895_p11 = por %p96_p7, %p40_p0 }
  0x13   : > { %p899_p12 = por %p102_p8, %p46_p3  ;;  %s904_s26 = sand.u32 1, %s809_s14  }
  0x14   : > { %s1130_s24 = scalar_select %p895_p11, 1, 0 }
  0x15   : > { %s1131_s25 = scalar_select %p899_p12, 1, 0 }
  0x16   : > { %s558_s27 = sshll.u32 %s813_s15, 7  ;;  %s557_s28 = sshll.u32 %s904_s26, 4 }
  0x17   : > { %s913_s4 = scalar_lea.hbm %s1122_s0, %s558_s27  ;;  %s152_s5 = scalar_lea.vmem [#allocation2], %s557_s28 }
  0x18   : > { %s158_s6 = sshll.u32 %s152_s5, 4  ;;  %p917_p13 = pnand %p619_p10, %p884_p5  ;;  %s921_s6 = int_to_ptr.vmem [resolvable:$true] %s158_s6 }
  0x19   : > { %s149_s8 = scalar_lea.sflag [#allocation3], %s904_s26  ;;  %s659_s9 = scalar_lea.hbm %s913_s4, 256 }
  0x1a   : > { %p660_p1 = scmp.ne.s32.totalorder %s913_s4, %s659_s9  ;;  %p661_p2 = pneg %p917_p13 }
  0x1b   : > { %s664_s17 = scalar_lea.hbm %s1122_s0, 512  ;;  %p665_p5 = scmp.lt.s32.totalorder %s913_s4, %s1122_s0 }
  0x1c   : > { %p662_p3 = pnand %p661_p2, %p660_p1  ;;  %p666_p7 = scmp.lt.s32.totalorder %s664_s17, %s659_s9 }
  0x1e   : > { %p663_p4 = pneg %p662_p3  ;;  %p667_p8 = por %p666_p7, %p665_p5 }
  0x20   : > { %p668_p10 = pnand %p667_p8, %p663_p4 }
  0x22   : > { %671 = shalt.err (!%p668_p10)
}
  0x23   : > { %s672_s22 = scalar_lea.vmem %s921_s6, 256  ;;  %s815_s28 = smov [#allocation2]  }
  0x24   : > { %p673_p9 = scmp.ne.s32.totalorder %s921_s6, %s672_s22  ;;  %s677_s29 = sshll.u32 %s815_s28, 4  ;;  %s678_s29 = int_to_ptr.vmem [resolvable:$false] %s677_s29 }
  0x25   : > { %s679_s30 = scalar_lea.vmem %s678_s29, 512  ;;  %p680_p0 = scmp.lt.s32.totalorder %s921_s6, %s678_s29 }
  0x26   : > { %p675_p1 = pnand %p673_p9, %p661_p2  ;;  %p681_p12 = scmp.lt.s32.totalorder %s679_s30, %s672_s22 }
  0x28   : > { %p676_p3 = pneg %p675_p1  ;;  %p682_p11 = por %p681_p12, %p680_p0 }
  0x2a   : > { %p683_p5 = pnand %p682_p11, %p676_p3 }
  0x2c   : > { %686 = shalt.err (!%p683_p5)
}
  0x2d   : > { %s816_s5 = smov 256   ;;  %s817_s9 = smov 128  }
  0x2e   : > { %s818_s10 = smov 8   ;;  %p186_p9 = scmp.lt.s32.totalorder %s813_s15, 3 }
  0x2f   : > { %608 = dma.hbm_to_vmem [thread:$0]  (!%p917_p13), %s913_s4, 256, %s921_s6, %s149_s8, %s816_s5, %s817_s9, %s818_s10  }
  0x30   : > { %s559_s11 = sshll.u32 %s904_s26, 6  ;;  %s961_s20 = scalar_lea.hbm %s1123_s1, %s558_s27 }
  0x31   : > { %p1133_p11 = scmp.ge.s32.totalorder %s813_s15, 1  ;;  %s172_s28 = scalar_lea.vmem [#allocation5], %s559_s11 }
  0x32   : > { %s178_s29 = sshll.u32 %s172_s28, 4  ;;  %s169_s4 = scalar_lea.sflag [#allocation6], %s904_s26  ;;  %s969_s29 = int_to_ptr.vmem [resolvable:$true] %s178_s29 }
  0x33   : > { %p965_p12 = pnand %p1133_p11, %p186_p9  ;;  %s687_s6 = scalar_lea.hbm %s961_s20, 1024 }
  0x34   : > { %p688_p0 = scmp.ne.s32.totalorder %s961_s20, %s687_s6  ;;  %s692_s30 = scalar_lea.hbm %s1123_s1, 2048 }
  0x35   : > { %p693_p8 = scmp.lt.s32.totalorder %s961_s20, %s1123_s1  ;;  %p694_p10 = scmp.lt.s32.totalorder %s692_s30, %s687_s6 }
  0x36   : > { %p690_p4 = pnand %p688_p0, %p661_p2 }
  0x37   : > { %p695_p1 = por %p694_p10, %p693_p8 }
  0x38   : > { %p691_p7 = pneg %p690_p4 }
  0x3a   : > { %p696_p3 = pnand %p695_p1, %p691_p7 }
  0x3c   : > { %699 = shalt.err (!%p696_p3)
}
  0x3d   : > { %s700_s26 = scalar_lea.vmem %s969_s29, 1024  ;;  %s819_s11 = smov [#allocation5]  }
  0x3e   : > { %p701_p5 = scmp.ne.s32.totalorder %s969_s29, %s700_s26  ;;  %s705_s28 = sshll.u32 %s819_s11, 4  ;;  %s706_s28 = int_to_ptr.vmem [resolvable:$false] %s705_s28 }
  0x3f   : > { %s707_s27 = scalar_lea.vmem %s706_s28, 2048  ;;  %p708_p0 = scmp.lt.s32.totalorder %s969_s29, %s706_s28 }
  0x40   : > { %p703_p9 = pnand %p701_p5, %p661_p2  ;;  %p709_p4 = scmp.lt.s32.totalorder %s707_s27, %s700_s26 }
  0x42   : > { %p704_p11 = pneg %p703_p9  ;;  %p710_p6 = por %p709_p4, %p708_p0 }
  0x44   : > { %p711_p8 = pnand %p710_p6, %p704_p11 }
  0x46   : > { %714 = shalt.err (!%p711_p8)
}
  0x47   : > { %611 = dma.hbm_to_vmem [thread:$0]  (!%p917_p13), %s961_s20, 1024, %s969_s29, %s169_s4, %s816_s5, %s817_s9, %s818_s10  }
  0x48   : > { %190 = sbr.rel (%p965_p12) target bundleno = 318 (0x13e), region = 28  ;;  %s1000_s6 = sand.u32 (!%p965_p12), 1, %s805_s13  }
  0x49   : > { %s562_s8 = sshll.u32 (!%p965_p12), %s1000_s6, 4  ;;  %s193_s30 = scalar_lea.sflag (!%p965_p12), [#allocation3], %s1000_s6 }
  0x4a   : > { %s1006_s7 = scalar_lea.vmem (!%p965_p12), [#allocation2], %s562_s8  ;;  %p1135_p6 = scmp.ne.s32.totalorder (!%p965_p12), %s1129_s23, 0 }
  0x4d   : > { %784 = dma.done.wait (%p1135_p6), %s193_s30, 256  }
  0x4e   : > { %786 = vsyncadd (%p1135_p6), %s193_s30, 4294967040  ;;  %s563_s5 = sshll.u32 %s1000_s6, 6  ;;  %s202_s9 = scalar_lea.sflag [#allocation6], %s1000_s6 }
  0x4f   : > { %s1014_s10 = scalar_lea.vmem [#allocation5], %s563_s5 }
  0x50   : > { %788 = dma.done.wait (%p1135_p6), %s202_s9, 1024  }
  0x51   : > { %790 = vsyncadd (%p1135_p6), %s202_s9, 4294966272  ;;  %v566_v0 = vld [vmem:[%s1006_s7] ss:$0 sm:$0xff]  ;;  %v567_v1 = vld [vmem:[%s1006_s7 + $0x8] ss:$0 sm:$0xff]  ;;  %s230_s23 = scalar_lea.vmem [#allocation7], %s562_s8 }
  0x52   : > { %v240_v2 = vld [vmem:[%s1014_s10] sm:$0xff]  ;;  %v570_v6 = vld [vmem:[%s1006_s7 + $0x9] ss:$0 sm:$0xff]  ;;  %v573_v11 = vld [vmem:[%s1006_s7 + $0xa] ss:$0 sm:$0xff]  ;;  %s413_s20 = sshll.u32 %s230_s23, 4  ;;  %s1047_s20 = int_to_ptr.vmem [resolvable:$true] %s413_s20 }
  0x53   : > { %v249_v3 = vsub.f32 %v566_v0, %v240_v2  ;;  %v250_v4 = vsub.f32 %v567_v1, %v240_v2  ;;  %v569_v5 = vld [vmem:[%s1006_s7 + $0x1] ss:$0 sm:$0xff]  ;;  %v568_v7 = vld [vmem:[%s1014_s10 + $0x8] sm:$0xff]  ;;  %v572_v10 = vld [vmem:[%s1006_s7 + $0x2] ss:$0 sm:$0xff]  ;;  %s591_s22 = sshll.u32 %s866_s16, 7 }
  0x54   : > { %v267_v8 = vsub.f32 %v569_v5, %v568_v7  ;;  %v268_v9 = vsub.f32 %v570_v6, %v568_v7  ;;  %v571_v12 = vld [vmem:[%s1014_s10 + $0x10] sm:$0xff]  ;;  %v576_v20 = vld [vmem:[%s1006_s7 + $0xb] ss:$0 sm:$0xff]  ;;  %v577_v24 = vld [vmem:[%s1014_s10 + $0x20] sm:$0xff]  ;;  %s1054_s17 = scalar_lea.hbm %s1124_s2, %s591_s22  ;;  %s396_s19 = scalar_lea.sflag [#allocation4], %s1000_s6 }
  0x55   : > { %v251_v13 = vand.u32 2147483647, %v249_v3  ;;  %v252_v14 = vand.u32 2147483647, %v250_v4  ;;  %v285_v15 = vsub.f32 %v572_v10, %v571_v12  ;;  %v286_v16 = vsub.f32 %v573_v11, %v571_v12  ;;  %v575_v17 = vld [vmem:[%s1006_s7 + $0x3] ss:$0 sm:$0xff] }
  0x56   : > { %v269_v18 = vand.u32 2147483647, %v267_v8  ;;  %v270_v19 = vand.u32 2147483647, %v268_v9  ;;  %v574_v23 = vld [vmem:[%s1014_s10 + $0x18] sm:$0xff]  ;;  %v580_v35 = vld [vmem:[%s1014_s10 + $0x28] sm:$0xff] }
  0x57   : > { %v287_v21 = vand.u32 2147483647, %v285_v15  ;;  %v288_v22 = vand.u32 2147483647, %v286_v16  ;;  %v303_v27 = vsub.f32 %v575_v17, %v574_v23  ;;  %v304_v28 = vsub.f32 %v576_v20, %v574_v23  ;;  %v578_v29 = vld [vmem:[%s1006_s7 + $0x4] ss:$0 sm:$0xff] }
  0x58   : > { %v271_v25 = vadd.f32 %v269_v18, %v251_v13  ;;  %v272_v26 = vadd.f32 %v270_v19, %v252_v14  ;;  %v579_v30 = vld [vmem:[%s1006_s7 + $0xc] ss:$0 sm:$0xff]  ;;  %v581_v31 = vld [vmem:[%s1006_s7 + $0x5] ss:$0 sm:$0xff]  ;;  %v321_v32 = vsub.f32 %v578_v29, %v577_v24  ;;  %v582_v34 = vld [vmem:[%s1006_s7 + $0xd] ss:$0 sm:$0xff] }
  0x59   : > { %v322_v33 = vsub.f32 %v579_v30, %v577_v24  ;;  %v584_v36 = vld [vmem:[%s1006_s7 + $0x6] ss:$0 sm:$0xff]  ;;  %v305_v39 = vand.u32 2147483647, %v303_v27  ;;  %v306_v40 = vand.u32 2147483647, %v304_v28  ;;  %v339_v44 = vsub.f32 %v581_v31, %v580_v35 }
  0x5a   : > { %v289_v37 = vadd.f32 %v287_v21, %v271_v25  ;;  %v290_v38 = vadd.f32 %v288_v22, %v272_v26  ;;  %v585_v41 = vld [vmem:[%s1006_s7 + $0xe] ss:$0 sm:$0xff]  ;;  %v323_v42 = vand.u32 2147483647, %v321_v32  ;;  %v340_v45 = vsub.f32 %v582_v34, %v580_v35  ;;  %v583_v46 = vld [vmem:[%s1014_s10 + $0x30] sm:$0xff]  ;;  %s715_s26 = scalar_lea.vmem %s1047_s20, 256 }
  0x5b   : > { %v324_v43 = vand.u32 2147483647, %v322_v33  ;;  %v586_v47 = vld [vmem:[%s1014_s10 + $0x38] sm:$0xff]  ;;  %v357_v50 = vsub.f32 %v584_v36, %v583_v46  ;;  %v358_v51 = vsub.f32 %v585_v41, %v583_v46  ;;  %v587_v52 = vld [vmem:[%s1006_s7 + $0x7] ss:$0 sm:$0xff]  ;;  %p716_p13 = scmp.ne.s32.totalorder %s1047_s20, %s715_s26  ;;  %p1136_p2 = scmp.ne.s32.totalorder %s1130_s24, 0 }
  0x5c   : > { %v307_v48 = vadd.f32 %v305_v39, %v289_v37  ;;  %v308_v49 = vadd.f32 %v306_v40, %v290_v38  ;;  %v588_v53 = vld [vmem:[%s1006_s7 + $0xf] ss:$0 sm:$0xff]  ;;  %v341_v54 = vand.u32 2147483647, %v339_v44  ;;  %v342_v55 = vand.u32 2147483647, %v340_v45 }
  0x5d   : > { %v375_v56 = vsub.f32 %v587_v52, %v586_v47  ;;  %v376_v57 = vsub.f32 %v588_v53, %v586_v47  ;;  %v359_v60 = vand.u32 2147483647, %v357_v50  ;;  %v360_v61 = vand.u32 2147483647, %v358_v51  ;;  %p717_p12 = pnand %p716_p13, %p1136_p2  ;;  %s820_s11 = smov [#allocation7]  }
  0x5e   : > { %v325_v58 = vadd.f32 %v323_v42, %v307_v48  ;;  %v326_v59 = vadd.f32 %v324_v43, %v308_v49  ;;  %s719_s28 = sshll.u32 %s820_s11, 4  ;;  %s720_s28 = int_to_ptr.vmem [resolvable:$false] %s719_s28 }
  0x5f   : > { %v377_v0 = vand.u32 2147483647, %v375_v56  ;;  %v378_v1 = vand.u32 2147483647, %v376_v57  ;;  %p718_p7 = pneg %p717_p12  ;;  %s721_s27 = scalar_lea.vmem %s720_s28, 512 }
  0x60   : > { %v343_v62 = vadd.f32 %v341_v54, %v325_v58  ;;  %v344_v63 = vadd.f32 %v342_v55, %v326_v59  ;;  %p722_p10 = scmp.lt.s32.totalorder %s1047_s20, %s720_s28  ;;  %p723_p1 = scmp.lt.s32.totalorder %s721_s27, %s715_s26 }
  0x62   : > { %v361_v2 = vadd.f32 %v359_v60, %v343_v62  ;;  %v362_v3 = vadd.f32 %v360_v61, %v344_v63  ;;  %p724_p3 = por %p723_p1, %p722_p10 }
  0x64   : > { %v379_v4 = vadd.f32 %v377_v0, %v361_v2  ;;  %v380_v5 = vadd.f32 %v378_v1, %v362_v3  ;;  %p725_p5 = pnand %p724_p3, %p718_p7 }
  0x66   : > { %381 = vst [vmem:[%s230_s23] sm:$0xff] %v379_v4  ;;  %382 = vst [vmem:[%s230_s23 + $0x8] sm:$0xff] %v380_v5  ;;  %v383_v6 = vadd.f32 %v380_v5, %v379_v4 }
  0x68   : > { %384 = vadd.xlane.f32.xlu0 %v383_v6 }
  0x69   : > { %728 = shalt.err (!%p725_p5)
}
  0x6a   : > { %s729_s8 = scalar_lea.hbm %s1054_s17, 256  ;;  %s733_s5 = scalar_lea.hbm %s1124_s2, 512 }
  0x6b   : > { %p730_p9 = scmp.ne.s32.totalorder %s1054_s17, %s729_s8  ;;  %p734_p4 = scmp.lt.s32.totalorder %s1054_s17, %s1124_s2 }
  0x6c   : > { %p735_p8 = scmp.lt.s32.totalorder %s733_s5, %s729_s8 }
  0x6d   : > { %p731_p11 = pnand %p730_p9, %p1136_p2 }
  0x6e   : > { %p736_p6 = por %p735_p8, %p734_p4 }
  0x6f   : > { %p732_p0 = pneg %p731_p11 }
  0x71   : > { %p737_p13 = pnand %p736_p6, %p732_p0 }
  0x73   : > { %740 = shalt.err (!%p737_p13)
}
  0x74   : > { %s821_s23 = smov 128   ;;  %s822_s29 = smov 256  }
  0x75   : > { %s823_s4 = smov 8   ;;  %s565_s26 = sshll.u32 %s1000_s6, 3 }
  0x76   : > { %601 = dma.vmem_to_hbm [thread:$0]  (%p1136_p2), %s1047_s20, 256, %s1054_s17, %s396_s19, %s821_s23, %s822_s29, %s823_s4  }
  0x77   : > { %s237_s11 = scalar_lea.vmem [#allocation8], %s565_s26  ;;  %s427_s19 = scalar_lea.hbm %s1125_s3, %s591_s22 }
  0x78   : > { %s429_s28 = sshll.u32 %s237_s11, 4  ;;  %s401_s8 = scalar_lea.sflag [#allocation9], %s1000_s6  ;;  %s1080_s28 = int_to_ptr.vmem [resolvable:$true] %s429_s28 }
  0x79   : > { %s741_s30 = scalar_lea.vmem %s1080_s28, 128  ;;  %s824_s7 = smov [#allocation8]  }
  0x7a   : > { %p742_p12 = scmp.ne.s32.totalorder %s1080_s28, %s741_s30  ;;  %s745_s5 = sshll.u32 %s824_s7, 4  ;;  %s746_s5 = int_to_ptr.vmem [resolvable:$false] %s745_s5 }
  0x7b   : > { %s747_s9 = scalar_lea.vmem %s746_s5, 256  ;;  %p748_p1 = scmp.lt.s32.totalorder %s1080_s28, %s746_s5 }
  0x7c   : > { %p743_p7 = pnand %p742_p12, %p1136_p2  ;;  %p749_p3 = scmp.lt.s32.totalorder %s747_s9, %s741_s30 }
  0x7e   : > { %p744_p10 = pneg %p743_p7  ;;  %p750_p5 = por %p749_p3, %p748_p1 }
  0x80   : > { %p751_p9 = pnand %p750_p5, %p744_p10 }
  0xf1   : > { %v385_v7 = vpop.xlane.xlu0 %384 }
  0xf2   : > { %v386_v8 = vrot.slane %v385_v7, 4 }
  0xf4   : > { %v387_v9 = vadd.f32 %v386_v8, %v385_v7 }
  0xf6   : > { %v388_v10 = vrot.slane %v387_v9, 2 }
  0xf8   : > { %v389_v11 = vadd.f32 %v388_v10, %v387_v9 }
  0xfa   : > { %v390_v12 = vrot.slane %v389_v11, 1 }
  0xfc   : > { %v391_v13 = vadd.f32 %v390_v12, %v389_v11 }
  0xfe   : > { %595 = vpush %v391_v13 }
 0x12f   : > { %s596_s27 = spop %595 }
 0x130   : > { %v393_v14 = vstv %s596_s27 }
 0x131   : > { %394 = vst [vmem:[%s237_s11] sm:$0xff] %v393_v14 }
 0x132   : > { %754 = shalt.err (!%p751_p9)
}
 0x133   : > { %s755_s16 = scalar_lea.hbm %s427_s19, 128  ;;  %s759_s10 = scalar_lea.hbm %s1125_s3, 256 }
 0x134   : > { %p756_p11 = scmp.ne.s32.totalorder %s427_s19, %s755_s16  ;;  %p760_p8 = scmp.lt.s32.totalorder %s427_s19, %s1125_s3 }
 0x135   : > { %p761_p6 = scmp.lt.s32.totalorder %s759_s10, %s755_s16 }
 0x136   : > { %p757_p0 = pnand %p756_p11, %p1136_p2 }
 0x137   : > { %p762_p13 = por %p761_p6, %p760_p8 }
 0x138   : > { %p758_p4 = pneg %p757_p0 }
 0x13a   : > { %p763_p12 = pnand %p762_p13, %p758_p4 }
 0x13c   : > { %766 = shalt.err (!%p763_p12)
}
 0x13d   : > { %602 = dma.vmem_to_hbm [thread:$0]  (%p1136_p2), %s1080_s28, 128, %s427_s19, %s401_s8  }
 0x13e PF: > { %s441_s4 = sand.u32 1, %s801_s12   ;;  %p1137_p7 = scmp.ne.s32.totalorder %s1131_s25, 0 }
 0x13f   : > { %p1138_p10 = scmp.ge.s32.totalorder %s813_s15, 2  ;;  %s442_s26 = scalar_lea.sflag [#allocation4], %s441_s4 }
 0x141   : > { %p613_p1 = pnand %p1138_p10, %p1137_p7 }
 0x143   : > { %p614_p3 = pneg %p613_p1 }
 0x145   : > { %792 = dma.done.wait (%p614_p3), %s442_s26, 256  }
 0x146   : > { %794 = vsyncadd (%p614_p3), %s442_s26, 4294967040  ;;  %s451_s11 = scalar_lea.sflag [#allocation9], %s441_s4 }
 0x147   : > { %796 = dma.done.wait (%p614_p3), %s451_s11, 128  }
 0x148   : > { %798 = vsyncadd (%p614_p3), %s451_s11, 4294967168  ;;  %p23_p2 = scmp.ge.s32.totalorder %s870_s18, 4   ;;  %s1139_s12 = smov %s805_s13 }
 0x149   : > { %s1140_s13 = smov %s809_s14  ;;  %s1141_s14 = smov %s882_s21 }
 0x14a   : > { %s1142_s15 = smov %s870_s18  ;;  %25 = sbr.rel (!%p23_p2) target bundleno = 9 (0x9), region = 110 }
 0x14f   :  { %456 = vsyncpa [#allocation3], 1 }
 0x150   :  { %458 = vsyncpa [#allocation3 + $0x1], 1 }
 0x151   :  { %459 = vsyncpa [#allocation6], 1 }
 0x152   :  { %461 = vsyncpa [#allocation6 + $0x1], 1 }
 0x153   :  { %462 = vsyncpa [#allocation4], 1 }
 0x154   :  { %464 = vsyncpa [#allocation4 + $0x1], 1 }
 0x155   :  { %465 = vsyncpa [#allocation9], 1 }
 0x156   :  { %467 = vsyncpa [#allocation9 + $0x1], 1 }

</bundles_post_ra>
